<compile_context>
chip_gen: v6e
topology: v6e:2x2x1
jax: 0.10.0
libtpu: 0.0.40
codegen_flags: <defaults>
</compile_context>

<pallas_src>
import jax
import jax.numpy as jnp
from jax.experimental import pallas as pl
from jax.experimental.pallas import tpu as pltpu

D_IN = 150     # feature dim
D_HID = 75     # fc1 output dim (padded to 128 lanes inside the wrapper)
D_OUT = 2      # fc2 output dim (folded into a single logit difference)
HID_PAD = 128  # lane-padded hidden width


def _round_up(x: int, m: int) -> int:
    return ((x + m - 1) // m) * m


def custom_mu_kernel(feat_ref, w1_ref, b1_ref, w2d_ref, b2d_ref,
                     left_ref, right_ref, out_ref):
    """One batch tile.

    feat_ref : (TB, 150)      features tile (f32 or bf16)
    w1_ref   : (150, 128)     fc1 weight, output-padded, resident
    b1_ref   : (1, 128)  f32  fc1 bias, output-padded, resident
    w2d_ref  : (1, 128)  f32  fc2 column difference w2[:,0]-w2[:,1], padded
    b2d_ref  : (1, 1)   SMEM  fc2 bias difference b2[0]-b2[1]
    left_ref, right_ref, out_ref : (TB, D) f32
    """
    # fc1 + relu: MXU matmul with f32 accumulation, full 128-lane hidden.
    h = jnp.dot(feat_ref[...], w1_ref[...], preferred_element_type=jnp.float32)
    h = jnp.maximum(h + b1_ref[...], 0.0)

    # 2-way softmax == sigmoid of the logit difference d.
    # VPU multiply + XLU lane reduce (padded lanes of h and w2d are zero);
    # exp and the approximate reciprocal both go to the EUP slot.
    d = jnp.sum(h * w2d_ref[...], axis=-1, keepdims=True) + b2d_ref[0, 0]
    a0 = pl.reciprocal(1.0 + jnp.exp(-d), approx=True)   # alpha[:, 0:1]

    r = right_ref[...]
    out_ref[...] = (r + a0 * (left_ref[...] - r)).astype(out_ref.dtype)


def custom_mu(features, left, right, w1, b1, w2, b2, *,
              block_b: int = 1024, compute_dtype=jnp.bfloat16):
    """features: (B,150); left/right: (B,D); w1:(150,75) b1:(1,75)/(75,)
    w2:(75,2) b2:(1,2)/(2,)  (weights stored (in,out), i.e. x @ W + b).
    Returns action (B, D) float32."""
    B, D = left.shape
    assert features.shape == (B, D_IN)
    assert right.shape == (B, D)

    # ---- parameter prep (tiny, one pass) ----
    w1 = jnp.asarray(w1, jnp.float32).reshape(D_IN, D_HID)
    b1 = jnp.asarray(b1, jnp.float32).reshape(1, D_HID)
    w2 = jnp.asarray(w2, jnp.float32).reshape(D_HID, D_OUT)
    b2 = jnp.asarray(b2, jnp.float32).reshape(D_OUT)

    w1p = jnp.zeros((D_IN, HID_PAD), jnp.float32).at[:, :D_HID].set(w1)
    b1p = jnp.zeros((1, HID_PAD), jnp.float32).at[:, :D_HID].set(b1)
    w2dp = jnp.zeros((1, HID_PAD), jnp.float32).at[0, :D_HID].set(w2[:, 0] - w2[:, 1])
    b2d = (b2[0] - b2[1]).reshape(1, 1).astype(jnp.float32)

    feat = jnp.asarray(features, compute_dtype)   # bf16 by default: halves HBM read
    w1p = w1p.astype(compute_dtype)
    left = jnp.asarray(left, jnp.float32)
    right = jnp.asarray(right, jnp.float32)

    # ---- batch tiling: NO host-side padding; ragged last block is masked ----
    # sublane multiple: 16 for packed (sub-32-bit) feature dtypes, 8 for f32.
    sub = 8 if jnp.dtype(compute_dtype).itemsize >= 4 else 16
    block_b = max(sub, _round_up(block_b, sub))
    # Aim for >= 2 tiles (so both v7x TensorCores get work) while capping at block_b.
    tb = min(block_b, max(sub, _round_up((B + 1) // 2, sub)))
    nb = pl.cdiv(B, tb)

    # Triple-buffer the dominant feature stream when the grid is deep enough.
    feat_kwargs = dict(pipeline_mode=pl.Buffered(3)) if nb >= 3 else {}

    out = pl.pallas_call(
        custom_mu_kernel,
        out_shape=jax.ShapeDtypeStruct((B, D), jnp.float32),
        grid=(nb,),
        in_specs=[
            pl.BlockSpec((tb, D_IN), lambda i: (i, 0), **feat_kwargs),  # features
            pl.BlockSpec((D_IN, HID_PAD), lambda i: (0, 0)),   # w1 (resident)
            pl.BlockSpec((1, HID_PAD), lambda i: (0, 0)),      # b1 (resident)
            pl.BlockSpec((1, HID_PAD), lambda i: (0, 0)),      # w2 col-diff
            pl.BlockSpec((1, 1), lambda i: (0, 0),
                         memory_space=pltpu.MemorySpace.SMEM),  # b2 diff scalar
            pl.BlockSpec((tb, D), lambda i: (i, 0)),           # left tile
            pl.BlockSpec((tb, D), lambda i: (i, 0)),           # right tile
        ],
        out_specs=pl.BlockSpec((tb, D), lambda i: (i, 0)),
        compiler_params=pltpu.CompilerParams(
            dimension_semantics=("parallel",),
            vmem_limit_bytes=32 * 1024 * 1024),
    )(feat, w1p, b1p, w2dp, b2d, left, right)

    return out


if __name__ == "__main__":
    key = jax.random.PRNGKey(0)
    k_feat, k_l, k_r, k_w1, k_b1, k_w2, k_b2 = jax.random.split(key, 7)

    B = 2      # batch
    D = 16     # flattened action dim for left/right tensors

    features = jax.random.normal(k_feat, (B, D_IN), dtype=jnp.float32)
    left = jax.random.normal(k_l, (B, D), dtype=jnp.float32)
    right = jax.random.normal(k_r, (B, D), dtype=jnp.float32)

    # PyTorch nn.Linear-equivalent parameters, stored (in, out) so x @ W + b.
    w1 = jax.random.normal(k_w1, (D_IN, D_HID), dtype=jnp.float32) * 0.05
    b1 = jax.random.normal(k_b1, (1, D_HID), dtype=jnp.float32) * 0.05
    w2 = jax.random.normal(k_w2, (D_HID, D_OUT), dtype=jnp.float32) * 0.05
    b2 = jax.random.normal(k_b2, (1, D_OUT), dtype=jnp.float32) * 0.05

    def ref_fn(f, l, r):
        h = jnp.maximum(f @ w1 + b1, 0.0)
        alpha = jax.nn.softmax(h @ w2 + b2, axis=1)
        return alpha[:, 0:1] * l + alpha[:, 1:2] * r

    # 1) Default path: bf16 features (halves the dominant HBM read).
    action = jax.block_until_ready(custom_mu(features, left, right, w1, b1, w2, b2))
    ref = ref_fn(features, left, right)
    assert action.shape == ref.shape
    assert jnp.allclose(action, ref, atol=3e-2, rtol=3e-2), "bf16-path mismatch vs reference"

    # 2) f32 path with multiple tiles and a ragged tail (B not a multiple of tb),
    #    exercising the un-padded boundary handling and Buffered(3).
    B2 = 137
    k2a, k2b, k2c = jax.random.split(jax.random.PRNGKey(1), 3)
    f2 = jax.random.normal(k2a, (B2, D_IN), dtype=jnp.float32)
    l2 = jax.random.normal(k2b, (B2, D), dtype=jnp.float32)
    r2 = jax.random.normal(k2c, (B2, D), dtype=jnp.float32)
    action2 = jax.block_until_ready(
        custom_mu(f2, l2, r2, w1, b1, w2, b2, block_b=48, compute_dtype=jnp.float32))
    ref2 = ref_fn(f2, l2, r2)
    assert action2.shape == ref2.shape
    # Tolerance loosened from 1e-5 because of the approximate EUP reciprocal.
    assert jnp.allclose(action2, ref2, atol=1e-2, rtol=1e-2), "f32-path mismatch vs reference"

    print("KERNEL_OK")
</pallas_src>

<mosaic_0001>
module attributes {stable_mosaic.version = 11 : i64} {
  func.func @custom_mu_kernel(%arg0: i32, %arg1: memref<16x150xbf16, #tpu.memory_space<vmem>>, %arg2: memref<150x128xbf16, #tpu.memory_space<vmem>>, %arg3: memref<1x128xf32, #tpu.memory_space<vmem>>, %arg4: memref<1x128xf32, #tpu.memory_space<vmem>>, %arg5: memref<1x1xf32, #tpu.memory_space<smem>>, %arg6: memref<16x16xf32, #tpu.memory_space<vmem>>, %arg7: memref<16x16xf32, #tpu.memory_space<vmem>>, %arg8: memref<16x16xf32, #tpu.memory_space<vmem>>) attributes {dimension_semantics = [#tpu.dimension_semantics<parallel>], iteration_bounds = array<i64: 1>, scalar_prefetch = 0 : i64, scratch_operands = 0 : i64, tpu.core_type = #tpu.core_type<tc>, window_params = [{transform_indices = @transform_0, window_bounds = array<i64: 16, 150>}, {pipeline_mode = #tpu.pipeline_mode<synchronous>, transform_indices = @transform_1, window_bounds = array<i64: 150, 128>}, {pipeline_mode = #tpu.pipeline_mode<synchronous>, transform_indices = @transform_2, window_bounds = array<i64: 1, 128>}, {pipeline_mode = #tpu.pipeline_mode<synchronous>, transform_indices = @transform_3, window_bounds = array<i64: 1, 128>}, {transform_indices = @transform_4, window_bounds = array<i64: 1, 1>}, {transform_indices = @transform_5, window_bounds = array<i64: 16, 16>}, {transform_indices = @transform_6, window_bounds = array<i64: 16, 16>}, {transform_indices = @transform_7, window_bounds = array<i64: 16, 16>}]} {
    %c0 = arith.constant 0 : index
    %c0_0 = arith.constant 0 : index
    %0 = vector.load %arg1[%c0, %c0_0] : memref<16x150xbf16, #tpu.memory_space<vmem>>, vector<16x150xbf16>
    %c0_1 = arith.constant 0 : index
    %c0_2 = arith.constant 0 : index
    %1 = vector.load %arg2[%c0_1, %c0_2] : memref<150x128xbf16, #tpu.memory_space<vmem>>, vector<150x128xbf16>
    %cst = arith.constant dense<0.000000e+00> : vector<16x128xf32>
    %2 = tpu.matmul %0, %1, %cst {dimension_numbers = #tpu.dot_dimension_numbers<[1], [0], [0], [1], [0, 0, 1, 1], [], []>} : vector<16x150xbf16>, vector<150x128xbf16>, vector<16x128xf32> -> vector<16x128xf32>
    %c0_3 = arith.constant 0 : index
    %c0_4 = arith.constant 0 : index
    %3 = vector.load %arg3[%c0_3, %c0_4] : memref<1x128xf32, #tpu.memory_space<vmem>>, vector<1x128xf32>
    %4 = vector.broadcast %3 : vector<1x128xf32> to vector<16x128xf32>
    %5 = arith.addf %2, %4 : vector<16x128xf32>
    %cst_5 = arith.constant 0.000000e+00 : f32
    %6 = vector.broadcast %cst_5 : f32 to vector<16x128xf32>
    %7 = arith.maximumf %5, %6 : vector<16x128xf32>
    %c0_6 = arith.constant 0 : index
    %c0_7 = arith.constant 0 : index
    %8 = vector.load %arg4[%c0_6, %c0_7] : memref<1x128xf32, #tpu.memory_space<vmem>>, vector<1x128xf32>
    %9 = vector.broadcast %8 : vector<1x128xf32> to vector<16x128xf32>
    %10 = arith.mulf %7, %9 : vector<16x128xf32>
    %cst_8 = arith.constant dense<0.000000e+00> : vector<16xf32>
    %11 = vector.multi_reduction <add>, %10, %cst_8 [1] : vector<16x128xf32> to vector<16xf32>
    %12 = vector.shape_cast %11 : vector<16xf32> to vector<16x1xf32>
    %c0_9 = arith.constant 0 : index
    %c0_10 = arith.constant 0 : index
    %13 = memref.load %arg5[%c0_9, %c0_10] : memref<1x1xf32, #tpu.memory_space<smem>>
    %14 = vector.broadcast %13 : f32 to vector<16x1xf32>
    %15 = arith.addf %12, %14 : vector<16x1xf32>
    %cst_11 = arith.constant 0.000000e+00 : f32
    %16 = vector.broadcast %cst_11 : f32 to vector<16x1xf32>
    %17 = arith.subf %16, %15 : vector<16x1xf32>
    %18 = math.exp %17 : vector<16x1xf32>
    %cst_12 = arith.constant 1.000000e+00 : f32
    %19 = vector.broadcast %cst_12 : f32 to vector<16x1xf32>
    %20 = arith.addf %19, %18 : vector<16x1xf32>
    %21 = tpu.reciprocal %20 {approx = true} : vector<16x1xf32> -> vector<16x1xf32>
    %c0_13 = arith.constant 0 : index
    %c0_14 = arith.constant 0 : index
    %22 = vector.load %arg7[%c0_13, %c0_14] : memref<16x16xf32, #tpu.memory_space<vmem>>, vector<16x16xf32>
    %c0_15 = arith.constant 0 : index
    %c0_16 = arith.constant 0 : index
    %23 = vector.load %arg6[%c0_15, %c0_16] : memref<16x16xf32, #tpu.memory_space<vmem>>, vector<16x16xf32>
    %24 = arith.subf %23, %22 : vector<16x16xf32>
    %25 = vector.broadcast %21 : vector<16x1xf32> to vector<16x16xf32>
    %26 = arith.mulf %25, %24 : vector<16x16xf32>
    %27 = arith.addf %22, %26 : vector<16x16xf32>
    %c0_17 = arith.constant 0 : index
    %c0_18 = arith.constant 0 : index
    %28 = vector.load %arg8[%c0_17, %c0_18] : memref<16x16xf32, #tpu.memory_space<vmem>>, vector<16x16xf32>
    tpu.vector_store %arg8[%c0_17, %c0_18], %27 {strides = array<i32>} : memref<16x16xf32, #tpu.memory_space<vmem>>, vector<16x16xf32>,
    return
  }
  func.func @transform_0(%arg0: i32) -> (i32, i32) {
    %c0_i32 = arith.constant 0 : i32
    %c0_i32_0 = arith.constant 0 : i32
    return %arg0, %c0_i32 : i32, i32
  }
  func.func @transform_1(%arg0: i32) -> (i32, i32) {
    %c0_i32 = arith.constant 0 : i32
    %c0_i32_0 = arith.constant 0 : i32
    %c0_i32_1 = arith.constant 0 : i32
    return %c0_i32, %c0_i32_0 : i32, i32
  }
  func.func @transform_2(%arg0: i32) -> (i32, i32) {
    %c0_i32 = arith.constant 0 : i32
    %c0_i32_0 = arith.constant 0 : i32
    %c0_i32_1 = arith.constant 0 : i32
    return %c0_i32, %c0_i32_0 : i32, i32
  }
  func.func @transform_3(%arg0: i32) -> (i32, i32) {
    %c0_i32 = arith.constant 0 : i32
    %c0_i32_0 = arith.constant 0 : i32
    %c0_i32_1 = arith.constant 0 : i32
    return %c0_i32, %c0_i32_0 : i32, i32
  }
  func.func @transform_4(%arg0: i32) -> (i32, i32) {
    %c0_i32 = arith.constant 0 : i32
    %c0_i32_0 = arith.constant 0 : i32
    %c0_i32_1 = arith.constant 0 : i32
    return %c0_i32, %c0_i32_0 : i32, i32
  }
  func.func @transform_5(%arg0: i32) -> (i32, i32) {
    %c0_i32 = arith.constant 0 : i32
    %c0_i32_0 = arith.constant 0 : i32
    return %arg0, %c0_i32 : i32, i32
  }
  func.func @transform_6(%arg0: i32) -> (i32, i32) {
    %c0_i32 = arith.constant 0 : i32
    %c0_i32_0 = arith.constant 0 : i32
    return %arg0, %c0_i32 : i32, i32
  }
  func.func @transform_7(%arg0: i32) -> (i32, i32) {
    %c0_i32 = arith.constant 0 : i32
    %c0_i32_0 = arith.constant 0 : i32
    return %arg0, %c0_i32 : i32, i32
  }
}

</mosaic_0001>

<bundles_post_ra>
// kernel: tpu_custom_call.1
= control target key start
LH: loop header
LB: loop body
LE: loop exit
PB: predicated region body
PF: predicated region fallthrough
CT: control target
= control target key end

     0   :  { %13 = vsyncpa [#allocation4], 0  ;;  %s546_s0 = inlined_call_operand.vmem [shape: bf16[2,150], index: 0, kind: input, shape index: {}]   ;;  %s547_s1 = inlined_call_operand.hbm [shape: bf16[150,128], index: 1, kind: input, shape index: {}]   ;;  %s548_s2 = inlined_call_operand.vmem [shape: f32[1,128], index: 2, kind: input, shape index: {}]   ;;  %s549_s3 = inlined_call_operand.hbm [shape: f32[1,128], index: 3, kind: input, shape index: {}]   ;;  %s550_s4 = inlined_call_operand.<no memory space> [shape: f32[1,1], index: 4, kind: input, shape index: {}]   ;;  %s551_s5 = inlined_call_operand.vmem [shape: f32[2,16], index: 5, kind: input, shape index: {}]   ;;  %s552_s6 = inlined_call_operand.vmem [shape: f32[2,16], index: 6, kind: input, shape index: {}]   ;;  %s553_s7 = inlined_call_operand.hbm [shape: f32[2,16], index: 7, kind: output, shape index: {}]  }
   0x1   :  { %14 = vsyncpa [#allocation7], 0 }
   0x2   :  { %15 = vsyncpa [#allocation5], 0  ;;  %s436_s24 = smov [#allocation3]  }
   0x3   :  { %s23_s25 = sshll.u32 %s436_s24, 4  ;;  %s24_s25 = int_to_ptr.vmem [resolvable:$true] %s23_s25 }
   0x4   :  { %s378_s26 = scalar_lea.vmem %s24_s25, 1216  ;;  %p383_p1 = scmp.lt.s32.totalorder %s24_s25, %s24_s25 }
   0x5   :  { %p379_p0 = scmp.ne.s32.totalorder %s24_s25, %s378_s26  ;;  %p384_p2 = scmp.lt.s32.totalorder %s378_s26, %s378_s26 }
   0x7   :  { %p385_p3 = por %p384_p2, %p383_p1 }
   0x9   :  { %p386_p4 = pnand %p385_p3, %p379_p0 }
   0xb   :  { %389 = shalt.err (!%p386_p4)
}
   0xc   :  { %s437_s27 = smov 64   ;;  %s438_s28 = smov 4  }
   0xd   :  { %29 = dma.hbm_to_vmem [thread:$0]  %s547_s1, 1216, %s24_s25, [#allocation4], %s437_s27, %s437_s27, %s438_s28  }
   0xe   :  { %s439_s8 = smov [#allocation6]  }
   0xf   :  { %s38_s9 = sshll.u32 %s439_s8, 4  ;;  %s39_s9 = int_to_ptr.vmem [resolvable:$true] %s38_s9 }
  0x10   :  { %s398_s10 = scalar_lea.vmem %s39_s9, 16  ;;  %s402_s11 = scalar_lea.vmem %s39_s9, 32 }
  0x11   :  { %p399_p5 = scmp.ne.s32.totalorder %s39_s9, %s398_s10  ;;  %p403_p6 = scmp.lt.s32.totalorder %s39_s9, %s39_s9 }
  0x12   :  { %p404_p7 = scmp.lt.s32.totalorder %s402_s11, %s398_s10 }
  0x14   :  { %p405_p8 = por %p404_p7, %p403_p6 }
  0x16   :  { %p406_p9 = pnand %p405_p8, %p399_p5 }
  0x18   :  { %409 = shalt.err (!%p406_p9)
}
  0x19   :  { %41 = dma.hbm_to_vmem [thread:$0]  %s549_s3, 16, %s39_s9, [#allocation7]  }
  0x1a   :  { %430 = dma.done.wait [#allocation4], 1216  }
  0x1b   :  { %431 = vsyncadd [#allocation4], 4294966080 }
  0x1c   :  { %432 = dma.done.wait [#allocation7], 16  }
  0x1d   :  { %433 = vsyncadd [#allocation7], 4294967280  ;;  %v440_v0 = vmov 0   ;;  %v352_v1 = vld [vmem:[#allocation3 + $0x38] sm:$0xff]   ;;  %v441_v2 = vmov 1966171168   ;;  %v104_v4 = vlaneseq  ;;  %v286_v56 = vstv %s550_s4 }
  0x1e   :  { %229 = vmatprep.subr.bf16.mxu0 %v440_v0  ;;  %v102_v3 = vunpack.c.l.s4 %v441_v2  ;;  %v353_v5 = vld [vmem:[#allocation3 + $0x30] sm:$0xff]   ;;  %v354_v8 = vld [vmem:[#allocation3 + $0x28] sm:$0xff]   ;;  %v55_v9 = vld [vmem:[%s546_s0] sm:$0x3]  ;;  %vm221_vm0 = vcmask 179200   ;;  %vm225_vm1 = vcmask 1042432  }
  0x1f   :  { %230 = vmatpush1.bf16.msra.mxu0 %v352_v1  ;;  %v105_v7 = vshrl.u32 %v104_v4, 7  ;;  %v355_v11 = vld [vmem:[#allocation3 + $0x20] sm:$0xff]   ;;  %v59_v15 = vld [vmem:[%s546_s0 + $0x8] sm:$0x3]  ;;  %v60_v16 = vld [vmem:[%s546_s0 + $0xa] sm:$0x3] }
  0x20   :  { %231 = vmatprep.subr.bf16.mxu0 %v440_v0  ;;  %v103_v6 = vunpack.c.0.s8 %v102_v3  ;;  %v56_v12 = vld [vmem:[%s546_s0 + $0x2] sm:$0x3]  ;;  %v57_v13 = vld [vmem:[%s546_s0 + $0x4] sm:$0x3]  ;;  %v58_v14 = vld [vmem:[%s546_s0 + $0x6] sm:$0x3]  ;;  %v99_v21 = vcombine.low %v59_v15, %v60_v16 }
  0x21   :  { %v97_v17 = vcombine.low %v55_v9, %v56_v12  ;;  %v61_v18 = vld [vmem:[%s546_s0 + $0xc] sm:$0x3]  ;;  %v62_v19 = vld [vmem:[%s546_s0 + $0xe] sm:$0x3]  ;;  %v98_v20 = vcombine.low %v57_v13, %v58_v14  ;;  %v356_v24 = vld [vmem:[#allocation3 + $0x18] sm:$0xff]   ;;  %vm309_vm2 = vcmask 130048  }
  0x22   :  { %v106_v10 = vsub.s32 %v103_v6, %v105_v7  ;;  %v100_v22 = vcombine.low %v61_v18, %v62_v19  ;;  %v357_v30 = vld [vmem:[#allocation3 + $0x10] sm:$0xff]   ;;  %v358_v34 = vld [vmem:[#allocation3 + $0x8] sm:$0xff]   ;;  %v359_v35 = vld [vmem:[#allocation3] sm:$0xff]  }
  0x23   :  { %232 = vmatpush1.bf16.msra.mxu0 %v353_v5  ;;  %v360_v36 = vld [vmem:[#allocation3 + $0x48] ss:$0 sps:$4 sm:$0x77]   ;;  %v361_v42 = vld [vmem:[#allocation3 + $0x40] sm:$0xff]   ;;  %v342_v48 = vld [vmem:[#allocation6] ss:$0 sm:$0xff] }
  0x24   :  { %233 = vmatprep.subr.bf16.mxu0 %v440_v0  ;;  %v107_v23 = vrot.slane %v97_v17, %v106_v10  ;;  %v114_v25 = vrot.slane %v98_v20, %v106_v10  ;;  %v121_v26 = vrot.slane %v99_v21, %v106_v10  ;;  %v128_v27 = vrot.slane %v100_v22, %v106_v10  ;;  %v330_v44 = vld [vmem:[%s548_s2] ss:$0 sm:$0xff]  ;;  %v302_v9 = vld [vmem:[%s551_s5 + $0x8] sm:$0xff] }
  0x25   :  { %v227_v39 = vsel %vm225_vm1, %v360_v36, 0  ;;  %v299_v5 = vld [vmem:[%s552_s6] sm:$0xff] }
  0x26   :  { %v130_v28 = vcombine.high %v107_v23, %v114_v25  ;;  %v132_v29 = vcombine.high %v121_v26, %v128_v27  ;;  %v129_v37 = vcombine.low %v107_v23, %v114_v25  ;;  %v131_v38 = vcombine.low %v121_v26, %v128_v27  ;;  %v301_v6 = vld [vmem:[%s551_s5] sm:$0xff] }
  0x27   :  { %234 = vmatpush1.bf16.msra.mxu0 %v354_v8  ;;  %v303_v7 = vsub.f32 %v301_v6, %v299_v5  ;;  %v300_v8 = vld [vmem:[%s552_s6 + $0x8] sm:$0xff] }
  0x28   :  { %235 = vmatprep.subr.bf16.mxu0 %v440_v0  ;;  %v146_v31 = vrot.slane %v130_v28, %v106_v10  ;;  %v160_v32 = vrot.slane %v132_v29, %v106_v10  ;;  %v139_v40 = vrot.slane %v129_v37, %v106_v10  ;;  %v153_v41 = vrot.slane %v131_v38, %v106_v10 }
  0x29   :  { %v304_v12 = vsub.f32 %v302_v9, %v300_v8 }
  0x2a   :  { %v162_v33 = vcombine.low %v146_v31, %v160_v32  ;;  %v161_v43 = vcombine.low %v139_v40, %v153_v41 }
  0x2b   :  { %236 = vmatpush1.bf16.msra.mxu0 %v355_v11 }
  0x2c   :  { %237 = vmatprep.subr.bf16.mxu0 %v440_v0  ;;  %341 = vmatprep.mubr.msk.bf16.mxu0 %vm221_vm0, %v162_v33 }
  0x2f   :  { %238 = vmatpush1.bf16.msra.mxu0 %v356_v24 }
  0x30   :  { %239 = vmatprep.subr.bf16.mxu0 %v440_v0 }
  0x33   :  { %240 = vmatpush1.bf16.msra.mxu0 %v357_v30 }
  0x34   :  { %241 = vmatprep.subr.bf16.mxu0 %v440_v0 }
  0x37   :  { %242 = vmatpush1.bf16.msra.mxu0 %v358_v34 }
  0x38   :  { %243 = vmatprep.subr.bf16.mxu0 %v440_v0 }
  0x3b   :  { %244 = vmatpush1.bf16.msra.mxu0 %v359_v35 }
  0x3c   :  { %257 = vmatprep.subr.bf16.mxu0 %v440_v0 }
  0x3f   :  { %258 = vmatpush2.bf16.msra.mxu0 %v227_v39 }
  0x40   :  { %259 = vmatprep.subr.bf16.mxu0 %v440_v0 }
  0x43   :  { %260 = vmatpush2.bf16.msra.mxu0 %v361_v42 }
  0x46   :  { %262 = vmatmul.mubr.bf16.vlgmr.msra.gmra.mxu0 %v161_v43 }
 0x106   :  { %v263_v45 = vpop.f32.mrf.mxu0 }
 0x107   :  { %v264_v46 = vadd.f32 %v330_v44, %v263_v45 }
 0x108   :  { %v265_v47 = vpop.f32.mrf.mxu0 }
 0x109   :  { %v270_v49 = vmax.f32 %v264_v46, 0.0 }
 0x10a   :  { %v266_v50 = vpop.f32.mrf.mxu0 }
 0x10b   :  { %v267_v51 = vadd.f32 %v330_v44, %v266_v50  ;;  %v279_v52 = vmul.f32 %v342_v48, %v270_v49 }
 0x10c   :  { %v268_v53 = vpop.f32.mrf.mxu0 }
 0x10d   :  { %v271_v54 = vmax.f32 %v267_v51, 0.0  ;;  %281 = vadd.xlane.f32.xlu0 %v279_v52 }
 0x10f   :  { %v280_v55 = vmul.f32 %v342_v48, %v271_v54 }
 0x111   :  { %283 = vadd.xlane.f32.xlu0 %v280_v55 }
 0x196   :  { %v282_v57 = vpop.xlane.xlu0 %281 }
 0x197   :  { %v287_v58 = vadd.f32 %v286_v56, %v282_v57 }
 0x199   :  { %v289_v59 = vsub.f32 0.0, %v287_v58 }
 0x19a   :  { %v284_v60 = vpop.xlane.xlu0 %283 }
 0x19b   :  { %v291_v61 = vmul.f32 1.442695, %v289_v59  ;;  %v288_v62 = vadd.f32 %v286_v56, %v284_v60 }
 0x19d   :  { %362 = vpow2.f32 %v291_v61  ;;  %v290_v63 = vsub.f32 0.0, %v288_v62 }
 0x19f   :  { %v293_v0 = vmul.f32 1.442695, %v290_v63 }
 0x1a1   :  { %364 = vpow2.f32 %v293_v0 }
 0x1aa   :  { %v363_v1 = vpop.eup %362 }
 0x1ab   :  { %v295_v2 = vadd.f32 1.0, %v363_v1 }
 0x1ad   :  { %366 = vrcp.f32 %v295_v2 }
 0x1ae   :  { %v365_v3 = vpop.eup %364 }
 0x1af   :  { %v296_v4 = vadd.f32 1.0, %v365_v3 }
 0x1b1   :  { %368 = vrcp.f32 %v296_v4 }
 0x1ba   :  { %v367_v10 = vpop.eup %366 }
 0x1bb   :  { %v305_v11 = vmul.f32 %v367_v10, %v303_v7 }
 0x1bd   :  { %v307_v13 = vadd.f32 %v305_v11, %v299_v5 }
 0x1be   :  { %v369_v14 = vpop.eup %368 }
 0x1bf   :  { %310 = vst.msk [vmem:[#allocation8] sm:$0xff] %vm309_vm2, %v307_v13  ;;  %v306_v15 = vmul.f32 %v369_v14, %v304_v12 }
 0x1c1   :  { %v308_v16 = vadd.f32 %v306_v15, %v300_v8 }
 0x1c3   :  { %311 = vst.msk [vmem:[#allocation8 + $0x8] sm:$0xff] %vm309_vm2, %v308_v16 }
 0x1c4   :  { %316 = vsyncadd [#allocation5], 224  ;;  %s442_s1 = smov [#allocation8]  }
 0x1c5   :  { %s317_s3 = sshll.u32 %s442_s1, 4  ;;  %s318_s3 = int_to_ptr.vmem [resolvable:$true] %s317_s3 }
 0x1c6   :  { %s410_s14 = scalar_lea.vmem %s318_s3, 32  ;;  %s414_s6 = scalar_lea.vmem %s318_s3, 256 }
 0x1c7   :  { %p411_p10 = scmp.ne.s32.totalorder %s318_s3, %s410_s14  ;;  %p415_p11 = scmp.lt.s32.totalorder %s318_s3, %s318_s3 }
 0x1c8   :  { %p416_p12 = scmp.lt.s32.totalorder %s414_s6, %s410_s14 }
 0x1ca   :  { %p417_p13 = por %p416_p12, %p415_p11 }
 0x1cc   :  { %p418_p0 = pnand %p417_p13, %p411_p10 }
 0x1ce   :  { %421 = shalt.err (!%p418_p0)
}
 0x1cf   :  { %s443_s5 = smov 32   ;;  %s444_s15 = smov 2  }
 0x1d0   :  { %323 = dma.vmem_to_hbm [thread:$0]  %s318_s3, 32, %s553_s7, [#allocation5], %s443_s5, %s443_s5, %s444_s15  }
 0x1d1   :  { %434 = dma.done.wait [#allocation5], 256  }
 0x1d2   :  { %435 = vsyncadd [#allocation5], 4294967040 }
 0x1d3   :  { %327 = vsyncpa [#allocation4], 1 }
 0x1d4   :  { %328 = vsyncpa [#allocation7], 1 }
 0x1d5   :  { %329 = vsyncpa [#allocation5], 1 }

</bundles_post_ra>
